<compile_context>
chip_gen: v7x
topology: tpu7x:2x2x1
jax: 0.10.0
libtpu: 0.0.40
codegen_flags: <defaults>
</compile_context>

<pallas_src>
import math
from functools import partial

import jax
import jax.numpy as jnp
from jax.experimental import pallas as pl
from jax.experimental.pallas import tpu as pltpu


def _round_up(x: int, m: int) -> int:
    return ((x + m - 1) // m) * m


def actor_kernel(
    state_ref, w1_ref, b1_ref, w2_ref, b2_ref, w3_ref, b3_ref,
    w4_ref, b4_ref, log_std_ref, eps_ref,
    out_ref,
    *, action_dim, min_log_std, max_log_std, min_action, max_action,
):
    x = state_ref[...]                                                    # (TB, S)

    # ---- MLP: Linear -> ReLU -> Linear -> ReLU -> Linear -> ReLU -> Linear
    h = jnp.dot(x, w1_ref[...], preferred_element_type=jnp.float32) + b1_ref[...]
    h = jnp.maximum(h, 0.0)
    h = jnp.dot(h, w2_ref[...], preferred_element_type=jnp.float32) + b2_ref[...]
    h = jnp.maximum(h, 0.0)
    h = jnp.dot(h, w3_ref[...], preferred_element_type=jnp.float32) + b3_ref[...]
    h = jnp.maximum(h, 0.0)
    mean = jnp.dot(h, w4_ref[...], preferred_element_type=jnp.float32) + b4_ref[...]  # (TB, A)

    # ---- Normal(mean, exp(clamp(log_std))) at true action width A (no padded lanes)
    log_std = jnp.clip(log_std_ref[...], min_log_std, max_log_std)       # (1, A)
    std = jnp.exp(log_std)
    inv_two_var = 0.5 * jnp.exp(-2.0 * log_std)                          # == 1/(2*std^2)

    # rsample + in-place clamp (matches action.clamp_)
    action = jnp.clip(mean + std * eps_ref[...], min_action, max_action)  # (TB, A)

    # Batch-independent constant term, reduced once per tile.
    const = jnp.sum(-log_std - 0.5 * math.log(2.0 * math.pi),
                    axis=-1, keepdims=True)                               # (1, 1)

    diff = action - mean
    quad = jnp.sum(diff * diff * inv_two_var, axis=-1, keepdims=True)     # (TB, 1)
    log_prob = const - quad                                               # (TB, 1)

    # Pack into one lane-dense 128-wide slab: zero-fill the block, then two
    # masked VMEM sub-writes; the HBM writeback stays a dense unmasked vst.
    A = action_dim
    out_ref[...] = jnp.zeros(out_ref.shape, out_ref.dtype)
    out_ref[:, :A] = action
    out_ref[:, A:A + 1] = log_prob
    # TODO(synk): on v5e at very large B, try a narrow (B, 16) output
    # (lanes 0..A-1 action, lane A log_prob) and keep whichever measures faster.


def prepare_actor_params(params):
    """Pad parameters to lane-dense shapes ONCE (cache & reuse across calls).

    hidden_dim is zero-padded to a multiple of 128 (padded units are inert:
    zero in/out weights).  The final layer keeps its true action width so all
    downstream math is unpadded."""
    S, H = params["w1"].shape
    A = params["w4"].shape[1]
    H_pad = _round_up(H, 128)

    def pad2(a, rows, cols):
        return jnp.pad(a, ((0, rows - a.shape[0]), (0, cols - a.shape[1])))

    return dict(
        w1=pad2(params["w1"], S, H_pad),      b1=pad2(params["b1"], 1, H_pad),
        w2=pad2(params["w2"], H_pad, H_pad),  b2=pad2(params["b2"], 1, H_pad),
        w3=pad2(params["w3"], H_pad, H_pad),  b3=pad2(params["b3"], 1, H_pad),
        w4=pad2(params["w4"], H_pad, A),      b4=params["b4"],
        log_std=params["log_std"],
    )


def actor_forward(state, padded_params, eps,
                  min_log_std=-20.0, max_log_std=2.0,
                  min_action=-1.0, max_action=1.0,
                  tile_b=2048):
    """state: (B, state_dim) f32, eps: (B, action_dim) f32 (~N(0,1)).
    padded_params: output of prepare_actor_params().
    Returns (action (B, A), log_prob (B, 1))."""
    p = padded_params
    B, S = state.shape
    H_pad = p["w1"].shape[1]
    A = p["w4"].shape[1]
    A_pad = _round_up(A + 1, 128)   # +1 lane for the packed log_prob

    # ---- Batch tiling: minimal tail padding; even tile count >= 2 whenever
    # B >= 16 so both v7x TensorCores get work under ("parallel",).
    n_tiles = max(1, -(-B // tile_b))
    if n_tiles == 1 and B >= 16:
        n_tiles = 2
    if n_tiles > 1 and n_tiles % 2 == 1:
        n_tiles += 1
    tb = _round_up(-(-B // n_tiles), 8)
    B_pad = tb * n_tiles

    if B_pad > B:
        state = jnp.pad(state, ((0, B_pad - B), (0, 0)))
        eps = jnp.pad(eps, ((0, B_pad - B), (0, 0)))

    grid = (n_tiles,)

    def stream_spec(cols):   # streamed per-tile (state / eps / output)
        return pl.BlockSpec((tb, cols), lambda i: (i, 0))

    def res_spec(shape):     # resident params: full block, constant index_map
        return pl.BlockSpec(shape, lambda i: (0, 0))

    kernel = partial(
        actor_kernel,
        action_dim=A,
        min_log_std=min_log_std, max_log_std=max_log_std,
        min_action=min_action, max_action=max_action,
    )

    param_names = ("w1", "b1", "w2", "b2", "w3", "b3", "w4", "b4", "log_std")
    param_bytes = 4 * sum(int(p[k].size) for k in param_names)
    stream_bytes_per_tile = 4 * tb * (S + A + A_pad)
    # Double-buffered streams + resident params + headroom, clamped <= 48 MiB
    # so the same tiling is safe on v7x's 64 MiB physical VMEM.
    vmem_limit = int(max(32 << 20,
                         min(48 << 20,
                             4 * stream_bytes_per_tile + 2 * param_bytes + (4 << 20))))

    flops = 2 * B_pad * (S * H_pad + 2 * H_pad * H_pad + H_pad * A)
    bytes_accessed = 4 * B_pad * (S + A + A_pad) + param_bytes

    out = pl.pallas_call(
        kernel,
        out_shape=jax.ShapeDtypeStruct((B_pad, A_pad), jnp.float32),
        grid=grid,
        in_specs=[
            stream_spec(S),
            res_spec(p["w1"].shape), res_spec(p["b1"].shape),
            res_spec(p["w2"].shape), res_spec(p["b2"].shape),
            res_spec(p["w3"].shape), res_spec(p["b3"].shape),
            res_spec(p["w4"].shape), res_spec(p["b4"].shape),
            res_spec(p["log_std"].shape),
            stream_spec(A),
        ],
        out_specs=stream_spec(A_pad),
        compiler_params=pltpu.CompilerParams(
            dimension_semantics=("parallel",),        # megacore on v7x
            vmem_limit_bytes=vmem_limit,
        ),
        cost_estimate=pl.CostEstimate(
            flops=flops,
            transcendentals=2 * A * n_tiles,
            bytes_accessed=bytes_accessed,
        ),
    )(state, p["w1"], p["b1"], p["w2"], p["b2"], p["w3"], p["b3"],
      p["w4"], p["b4"], p["log_std"], eps)

    action = out[:B, :A]
    log_prob = out[:B, A:A + 1]
    return action, log_prob


def init_actor_params(key, state_dim, action_dim, hidden_dim):
    """Deterministic init mimicking nn.Linear's U(-1/sqrt(fan_in), 1/sqrt(fan_in)).
    Weights stored as (in, out); biases and log_std stored as (1, dim)."""
    def linear(k, fan_in, fan_out):
        kw, kb = jax.random.split(k)
        bound = 1.0 / math.sqrt(fan_in)
        w = jax.random.uniform(kw, (fan_in, fan_out), jnp.float32, -bound, bound)
        b = jax.random.uniform(kb, (1, fan_out), jnp.float32, -bound, bound)
        return w, b

    k1, k2, k3, k4 = jax.random.split(key, 4)
    w1, b1 = linear(k1, state_dim, hidden_dim)
    w2, b2 = linear(k2, hidden_dim, hidden_dim)
    w3, b3 = linear(k3, hidden_dim, hidden_dim)
    w4, b4 = linear(k4, hidden_dim, action_dim)
    log_std = jnp.zeros((1, action_dim), jnp.float32)  # nn.Parameter(zeros)
    return dict(w1=w1, b1=b1, w2=w2, b2=b2, w3=w3, b3=b3, w4=w4, b4=b4,
                log_std=log_std)


def actor_forward_ref(state, params, eps,
                      min_log_std=-20.0, max_log_std=2.0,
                      min_action=-1.0, max_action=1.0):
    """Pure-JAX reference for correctness checking."""
    h = jnp.maximum(state @ params["w1"] + params["b1"], 0.0)
    h = jnp.maximum(h @ params["w2"] + params["b2"], 0.0)
    h = jnp.maximum(h @ params["w3"] + params["b3"], 0.0)
    mean = h @ params["w4"] + params["b4"]
    log_std = jnp.clip(params["log_std"], min_log_std, max_log_std)
    std = jnp.exp(log_std)
    action = jnp.clip(mean + std * eps, min_action, max_action)
    lp = (-((action - mean) ** 2) / (2.0 * std * std)
          - log_std - 0.5 * math.log(2.0 * math.pi))
    return action, jnp.sum(lp, axis=-1, keepdims=True)


if __name__ == "__main__":
    batch, state_dim, action_dim, hidden_dim = 8, 16, 8, 32

    key = jax.random.PRNGKey(0)
    k_params, k_state, k_eps = jax.random.split(key, 3)

    params = init_actor_params(k_params, state_dim, action_dim, hidden_dim)
    padded = prepare_actor_params(params)   # padded ONCE, reused every call
    state = jax.random.normal(k_state, (batch, state_dim), jnp.float32)
    # TODO(synk): for production-scale batches, generate eps inside the kernel
    # via pltpu.prng_seed + pltpu.stateful_normal to remove this HBM input
    # stream entirely (changes the random stream vs this JAX reference).
    eps = jax.random.normal(k_eps, (batch, action_dim), jnp.float32)

    action, log_prob = actor_forward(state, padded, eps)
    jax.block_until_ready((action, log_prob))

    # sanity check against pure-JAX reference
    action_ref, log_prob_ref = actor_forward_ref(state, params, eps)
    assert action.shape == (batch, action_dim)
    assert log_prob.shape == (batch, 1)
    assert jnp.allclose(action, action_ref, atol=1e-5, rtol=1e-5)
    assert jnp.allclose(log_prob, log_prob_ref, atol=1e-4, rtol=1e-5)

    print("KERNEL_OK")
</pallas_src>

<mosaic_0001>
module attributes {stable_mosaic.version = 11 : i64} {
  func.func @actor_kernel(%arg0: i32, %arg1: memref<8x16xf32, #tpu.memory_space<vmem>>, %arg2: memref<16x128xf32, #tpu.memory_space<vmem>>, %arg3: memref<1x128xf32, #tpu.memory_space<vmem>>, %arg4: memref<128x128xf32, #tpu.memory_space<vmem>>, %arg5: memref<1x128xf32, #tpu.memory_space<vmem>>, %arg6: memref<128x128xf32, #tpu.memory_space<vmem>>, %arg7: memref<1x128xf32, #tpu.memory_space<vmem>>, %arg8: memref<128x8xf32, #tpu.memory_space<vmem>>, %arg9: memref<1x8xf32, #tpu.memory_space<vmem>>, %arg10: memref<1x8xf32, #tpu.memory_space<vmem>>, %arg11: memref<8x8xf32, #tpu.memory_space<vmem>>, %arg12: memref<8x128xf32, #tpu.memory_space<vmem>>) attributes {dimension_semantics = [#tpu.dimension_semantics<parallel>], iteration_bounds = array<i64: 1>, scalar_prefetch = 0 : i64, scratch_operands = 0 : i64, tpu.core_type = #tpu.core_type<tc>, window_params = [{transform_indices = @transform_0, window_bounds = array<i64: 8, 16>}, {pipeline_mode = #tpu.pipeline_mode<synchronous>, transform_indices = @transform_1, window_bounds = array<i64: 16, 128>}, {pipeline_mode = #tpu.pipeline_mode<synchronous>, transform_indices = @transform_2, window_bounds = array<i64: 1, 128>}, {pipeline_mode = #tpu.pipeline_mode<synchronous>, transform_indices = @transform_3, window_bounds = array<i64: 128, 128>}, {pipeline_mode = #tpu.pipeline_mode<synchronous>, transform_indices = @transform_4, window_bounds = array<i64: 1, 128>}, {pipeline_mode = #tpu.pipeline_mode<synchronous>, transform_indices = @transform_5, window_bounds = array<i64: 128, 128>}, {pipeline_mode = #tpu.pipeline_mode<synchronous>, transform_indices = @transform_6, window_bounds = array<i64: 1, 128>}, {pipeline_mode = #tpu.pipeline_mode<synchronous>, transform_indices = @transform_7, window_bounds = array<i64: 128, 8>}, {pipeline_mode = #tpu.pipeline_mode<synchronous>, transform_indices = @transform_8, window_bounds = array<i64: 1, 8>}, {pipeline_mode = #tpu.pipeline_mode<synchronous>, transform_indices = @transform_9, window_bounds = array<i64: 1, 8>}, {transform_indices = @transform_10, window_bounds = array<i64: 8, 8>}, {transform_indices = @transform_11, window_bounds = array<i64: 8, 128>}]} {
    %c0 = arith.constant 0 : index
    %c0_0 = arith.constant 0 : index
    %0 = vector.load %arg1[%c0, %c0_0] : memref<8x16xf32, #tpu.memory_space<vmem>>, vector<8x16xf32>
    %c0_1 = arith.constant 0 : index
    %c0_2 = arith.constant 0 : index
    %1 = vector.load %arg2[%c0_1, %c0_2] : memref<16x128xf32, #tpu.memory_space<vmem>>, vector<16x128xf32>
    %cst = arith.constant dense<0.000000e+00> : vector<8x128xf32>
    %2 = tpu.matmul %0, %1, %cst {dimension_numbers = #tpu.dot_dimension_numbers<[1], [0], [0], [1], [0, 0, 1, 1], [], []>} : vector<8x16xf32>, vector<16x128xf32>, vector<8x128xf32> -> vector<8x128xf32>
    %c0_3 = arith.constant 0 : index
    %c0_4 = arith.constant 0 : index
    %3 = vector.load %arg3[%c0_3, %c0_4] : memref<1x128xf32, #tpu.memory_space<vmem>>, vector<1x128xf32>
    %4 = vector.broadcast %3 : vector<1x128xf32> to vector<8x128xf32>
    %5 = arith.addf %2, %4 : vector<8x128xf32>
    %cst_5 = arith.constant 0.000000e+00 : f32
    %6 = vector.broadcast %cst_5 : f32 to vector<8x128xf32>
    %7 = arith.maximumf %5, %6 : vector<8x128xf32>
    %c0_6 = arith.constant 0 : index
    %c0_7 = arith.constant 0 : index
    %8 = vector.load %arg4[%c0_6, %c0_7] : memref<128x128xf32, #tpu.memory_space<vmem>>, vector<128x128xf32>
    %cst_8 = arith.constant dense<0.000000e+00> : vector<8x128xf32>
    %9 = tpu.matmul %7, %8, %cst_8 {dimension_numbers = #tpu.dot_dimension_numbers<[1], [0], [0], [1], [0, 0, 1, 1], [], []>} : vector<8x128xf32>, vector<128x128xf32>, vector<8x128xf32> -> vector<8x128xf32>
    %c0_9 = arith.constant 0 : index
    %c0_10 = arith.constant 0 : index
    %10 = vector.load %arg5[%c0_9, %c0_10] : memref<1x128xf32, #tpu.memory_space<vmem>>, vector<1x128xf32>
    %11 = vector.broadcast %10 : vector<1x128xf32> to vector<8x128xf32>
    %12 = arith.addf %9, %11 : vector<8x128xf32>
    %cst_11 = arith.constant 0.000000e+00 : f32
    %13 = vector.broadcast %cst_11 : f32 to vector<8x128xf32>
    %14 = arith.maximumf %12, %13 : vector<8x128xf32>
    %c0_12 = arith.constant 0 : index
    %c0_13 = arith.constant 0 : index
    %15 = vector.load %arg6[%c0_12, %c0_13] : memref<128x128xf32, #tpu.memory_space<vmem>>, vector<128x128xf32>
    %cst_14 = arith.constant dense<0.000000e+00> : vector<8x128xf32>
    %16 = tpu.matmul %14, %15, %cst_14 {dimension_numbers = #tpu.dot_dimension_numbers<[1], [0], [0], [1], [0, 0, 1, 1], [], []>} : vector<8x128xf32>, vector<128x128xf32>, vector<8x128xf32> -> vector<8x128xf32>
    %c0_15 = arith.constant 0 : index
    %c0_16 = arith.constant 0 : index
    %17 = vector.load %arg7[%c0_15, %c0_16] : memref<1x128xf32, #tpu.memory_space<vmem>>, vector<1x128xf32>
    %18 = vector.broadcast %17 : vector<1x128xf32> to vector<8x128xf32>
    %19 = arith.addf %16, %18 : vector<8x128xf32>
    %cst_17 = arith.constant 0.000000e+00 : f32
    %20 = vector.broadcast %cst_17 : f32 to vector<8x128xf32>
    %21 = arith.maximumf %19, %20 : vector<8x128xf32>
    %c0_18 = arith.constant 0 : index
    %c0_19 = arith.constant 0 : index
    %22 = vector.load %arg8[%c0_18, %c0_19] : memref<128x8xf32, #tpu.memory_space<vmem>>, vector<128x8xf32>
    %cst_20 = arith.constant dense<0.000000e+00> : vector<8x8xf32>
    %23 = tpu.matmul %21, %22, %cst_20 {dimension_numbers = #tpu.dot_dimension_numbers<[1], [0], [0], [1], [0, 0, 1, 1], [], []>} : vector<8x128xf32>, vector<128x8xf32>, vector<8x8xf32> -> vector<8x8xf32>
    %c0_21 = arith.constant 0 : index
    %c0_22 = arith.constant 0 : index
    %24 = vector.load %arg9[%c0_21, %c0_22] : memref<1x8xf32, #tpu.memory_space<vmem>>, vector<1x8xf32>
    %25 = vector.broadcast %24 : vector<1x8xf32> to vector<8x8xf32>
    %26 = arith.addf %23, %25 : vector<8x8xf32>
    %c0_23 = arith.constant 0 : index
    %c0_24 = arith.constant 0 : index
    %27 = vector.load %arg10[%c0_23, %c0_24] : memref<1x8xf32, #tpu.memory_space<vmem>>, vector<1x8xf32>
    %cst_25 = arith.constant -2.000000e+01 : f32
    %cst_26 = arith.constant 2.000000e+00 : f32
    %28 = vector.broadcast %cst_25 : f32 to vector<1x8xf32>
    %29 = arith.maximumf %28, %27 : vector<1x8xf32>
    %30 = vector.broadcast %cst_26 : f32 to vector<1x8xf32>
    %31 = arith.minimumf %30, %29 : vector<1x8xf32>
    %32 = math.exp %31 : vector<1x8xf32>
    %cst_27 = arith.constant -2.000000e+00 : f32
    %33 = vector.broadcast %cst_27 : f32 to vector<1x8xf32>
    %34 = arith.mulf %33, %31 : vector<1x8xf32>
    %35 = math.exp %34 : vector<1x8xf32>
    %cst_28 = arith.constant 5.000000e-01 : f32
    %36 = vector.broadcast %cst_28 : f32 to vector<1x8xf32>
    %37 = arith.mulf %36, %35 : vector<1x8xf32>
    %c0_29 = arith.constant 0 : index
    %c0_30 = arith.constant 0 : index
    %38 = vector.load %arg11[%c0_29, %c0_30] : memref<8x8xf32, #tpu.memory_space<vmem>>, vector<8x8xf32>
    %39 = vector.broadcast %32 : vector<1x8xf32> to vector<8x8xf32>
    %40 = arith.mulf %39, %38 : vector<8x8xf32>
    %41 = arith.addf %26, %40 : vector<8x8xf32>
    %cst_31 = arith.constant -1.000000e+00 : f32
    %cst_32 = arith.constant 1.000000e+00 : f32
    %42 = vector.broadcast %cst_31 : f32 to vector<8x8xf32>
    %43 = arith.maximumf %42, %41 : vector<8x8xf32>
    %44 = vector.broadcast %cst_32 : f32 to vector<8x8xf32>
    %45 = arith.minimumf %44, %43 : vector<8x8xf32>
    %cst_33 = arith.constant 0.000000e+00 : f32
    %46 = vector.broadcast %cst_33 : f32 to vector<1x8xf32>
    %47 = arith.subf %46, %31 : vector<1x8xf32>
    %cst_34 = arith.constant 0.918938517 : f32
    %48 = vector.broadcast %cst_34 : f32 to vector<1x8xf32>
    %49 = arith.subf %47, %48 : vector<1x8xf32>
    %cst_35 = arith.constant dense<0.000000e+00> : vector<1xf32>
    %50 = vector.multi_reduction <add>, %49, %cst_35 [1] : vector<1x8xf32> to vector<1xf32>
    %51 = vector.shape_cast %50 : vector<1xf32> to vector<1x1xf32>
    %52 = arith.subf %45, %26 : vector<8x8xf32>
    %53 = arith.mulf %52, %52 : vector<8x8xf32>
    %54 = vector.broadcast %37 : vector<1x8xf32> to vector<8x8xf32>
    %55 = arith.mulf %53, %54 : vector<8x8xf32>
    %cst_36 = arith.constant dense<0.000000e+00> : vector<8xf32>
    %56 = vector.multi_reduction <add>, %55, %cst_36 [1] : vector<8x8xf32> to vector<8xf32>
    %57 = vector.shape_cast %56 : vector<8xf32> to vector<8x1xf32>
    %58 = vector.broadcast %51 : vector<1x1xf32> to vector<8x1xf32>
    %59 = arith.subf %58, %57 : vector<8x1xf32>
    %cst_37 = arith.constant 0.000000e+00 : f32
    %60 = vector.broadcast %cst_37 : f32 to vector<8x128xf32>
    %c0_38 = arith.constant 0 : index
    %c0_39 = arith.constant 0 : index
    %61 = vector.load %arg12[%c0_38, %c0_39] : memref<8x128xf32, #tpu.memory_space<vmem>>, vector<8x128xf32>
    tpu.vector_store %arg12[%c0_38, %c0_39], %60 {strides = array<i32>} : memref<8x128xf32, #tpu.memory_space<vmem>>, vector<8x128xf32>,
    %c0_40 = arith.constant 0 : index
    %c0_41 = arith.constant 0 : index
    %62 = vector.load %arg12[%c0_40, %c0_41] : memref<8x128xf32, #tpu.memory_space<vmem>>, vector<8x8xf32>
    tpu.vector_store %arg12[%c0_40, %c0_41], %45 {strides = array<i32>} : memref<8x128xf32, #tpu.memory_space<vmem>>, vector<8x8xf32>,
    %c0_42 = arith.constant 0 : index
    %c8 = arith.constant 8 : index
    %63 = vector.load %arg12[%c0_42, %c8] : memref<8x128xf32, #tpu.memory_space<vmem>>, vector<8x1xf32>
    tpu.vector_store %arg12[%c0_42, %c8], %59 {strides = array<i32>} : memref<8x128xf32, #tpu.memory_space<vmem>>, vector<8x1xf32>,
    return
  }
  func.func @transform_0(%arg0: i32) -> (i32, i32) {
    %c0_i32 = arith.constant 0 : i32
    %c0_i32_0 = arith.constant 0 : i32
    return %arg0, %c0_i32 : i32, i32
  }
  func.func @transform_1(%arg0: i32) -> (i32, i32) {
    %c0_i32 = arith.constant 0 : i32
    %c0_i32_0 = arith.constant 0 : i32
    %c0_i32_1 = arith.constant 0 : i32
    return %c0_i32, %c0_i32_0 : i32, i32
  }
  func.func @transform_2(%arg0: i32) -> (i32, i32) {
    %c0_i32 = arith.constant 0 : i32
    %c0_i32_0 = arith.constant 0 : i32
    %c0_i32_1 = arith.constant 0 : i32
    return %c0_i32, %c0_i32_0 : i32, i32
  }
  func.func @transform_3(%arg0: i32) -> (i32, i32) {
    %c0_i32 = arith.constant 0 : i32
    %c0_i32_0 = arith.constant 0 : i32
    %c0_i32_1 = arith.constant 0 : i32
    return %c0_i32, %c0_i32_0 : i32, i32
  }
  func.func @transform_4(%arg0: i32) -> (i32, i32) {
    %c0_i32 = arith.constant 0 : i32
    %c0_i32_0 = arith.constant 0 : i32
    %c0_i32_1 = arith.constant 0 : i32
    return %c0_i32, %c0_i32_0 : i32, i32
  }
  func.func @transform_5(%arg0: i32) -> (i32, i32) {
    %c0_i32 = arith.constant 0 : i32
    %c0_i32_0 = arith.constant 0 : i32
    %c0_i32_1 = arith.constant 0 : i32
    return %c0_i32, %c0_i32_0 : i32, i32
  }
  func.func @transform_6(%arg0: i32) -> (i32, i32) {
    %c0_i32 = arith.constant 0 : i32
    %c0_i32_0 = arith.constant 0 : i32
    %c0_i32_1 = arith.constant 0 : i32
    return %c0_i32, %c0_i32_0 : i32, i32
  }
  func.func @transform_7(%arg0: i32) -> (i32, i32) {
    %c0_i32 = arith.constant 0 : i32
    %c0_i32_0 = arith.constant 0 : i32
    %c0_i32_1 = arith.constant 0 : i32
    return %c0_i32, %c0_i32_0 : i32, i32
  }
  func.func @transform_8(%arg0: i32) -> (i32, i32) {
    %c0_i32 = arith.constant 0 : i32
    %c0_i32_0 = arith.constant 0 : i32
    %c0_i32_1 = arith.constant 0 : i32
    return %c0_i32, %c0_i32_0 : i32, i32
  }
  func.func @transform_9(%arg0: i32) -> (i32, i32) {
    %c0_i32 = arith.constant 0 : i32
    %c0_i32_0 = arith.constant 0 : i32
    %c0_i32_1 = arith.constant 0 : i32
    return %c0_i32, %c0_i32_0 : i32, i32
  }
  func.func @transform_10(%arg0: i32) -> (i32, i32) {
    %c0_i32 = arith.constant 0 : i32
    %c0_i32_0 = arith.constant 0 : i32
    return %arg0, %c0_i32 : i32, i32
  }
  func.func @transform_11(%arg0: i32) -> (i32, i32) {
    %c0_i32 = arith.constant 0 : i32
    %c0_i32_0 = arith.constant 0 : i32
    return %arg0, %c0_i32 : i32, i32
  }
}

</mosaic_0001>

<bundles_post_ra>
// kernel: tpu_custom_call.1
= control target key start
LH: loop header
LB: loop body
LE: loop exit
PB: predicated region body
PF: predicated region fallthrough
CT: control target
= control target key end

     0   :  { %16 = vsyncpa [#allocation3], 0  ;;  %s1129_s0 = inlined_call_operand.hbm [shape: f32[8,16], index: 0, kind: input, shape index: {}]   ;;  %s1130_s1 = inlined_call_operand.vmem [shape: f32[16,128], index: 1, kind: input, shape index: {}]   ;;  %s1131_s2 = inlined_call_operand.vmem [shape: f32[1,128], index: 2, kind: input, shape index: {}]   ;;  %s1132_s3 = inlined_call_operand.vmem [shape: f32[128,128], index: 3, kind: input, shape index: {}]   ;;  %s1133_s4 = inlined_call_operand.vmem [shape: f32[1,128], index: 4, kind: input, shape index: {}]   ;;  %s1134_s5 = inlined_call_operand.hbm [shape: f32[128,128], index: 5, kind: input, shape index: {}]   ;;  %s1135_s6 = inlined_call_operand.hbm [shape: f32[1,128], index: 6, kind: input, shape index: {}]   ;;  %s1136_s7 = inlined_call_operand.vmem [shape: f32[128,8], index: 7, kind: input, shape index: {}]   ;;  %s1137_s8 = inlined_call_operand.vmem [shape: f32[1,8], index: 8, kind: input, shape index: {}]   ;;  %s1138_s9 = inlined_call_operand.vmem [shape: f32[1,8], index: 9, kind: input, shape index: {}]   ;;  %s1139_s10 = inlined_call_operand.vmem [shape: f32[8,8], index: 10, kind: input, shape index: {}]   ;;  %s1140_s11 = inlined_call_operand.hbm [shape: f32[8,128], index: 11, kind: output, shape index: {}]  }
   0x1   :  { %17 = vsyncpa [#allocation6], 0 }
   0x2   :  { %18 = vsyncpa [#allocation4], 0  ;;  %s861_s17 = smov [#allocation5]   ;;  %s767_s21 = scalar_lea.hbm %s1134_s5, 2048 }
   0x3   :  { %s42_s18 = sshll.u32 %s861_s17, 4  ;;  %p768_p0 = scmp.ne.s32.totalorder %s1134_s5, %s767_s21  ;;  %s43_s18 = int_to_ptr.vmem [resolvable:$true] %s42_s18 }
   0x4   :  { %p771_p1 = scmp.lt.u32.totalorder %s767_s21, %s1134_s5 }
   0x6   :  { %p773_p2 = pnand %p771_p1, %p768_p0 }
   0x8   :  { %776 = shalt.err (!%p773_p2)
}
   0x9   :  { %s777_s26 = scalar_lea.vmem %s43_s18, 2048  ;;  %p782_p4 = scmp.lt.s32.totalorder %s43_s18, %s43_s18 }
   0xa   :  { %p778_p3 = scmp.ne.s32.totalorder %s43_s18, %s777_s26  ;;  %p783_p5 = scmp.lt.s32.totalorder %s777_s26, %s777_s26 }
   0xc   :  { %p784_p6 = por %p783_p5, %p782_p4 }
   0xe   :  { %p785_p7 = pnand %p784_p6, %p778_p3 }
  0x10   :  { %788 = shalt.err (!%p785_p7)
}
  0x11   :  { %s862_s27 = smov 128   ;;  %s863_s28 = smov 8  }
  0x12   :  { %48 = dma.hbm_to_vmem [thread:$0]  %s1134_s5, 2048, %s43_s18, [#allocation6], %s862_s27, %s862_s27, %s863_s28  }
  0x13   :  { %s864_s12 = smov [#allocation2]   ;;  %s865_s14 = smov [#allocation7]  }
  0x14   :  { %s25_s13 = sshll.u32 %s864_s12, 4  ;;  %s55_s15 = sshll.u32 %s865_s14, 4  ;;  %s26_s13 = int_to_ptr.vmem [resolvable:$true] %s25_s13  ;;  %s56_s15 = int_to_ptr.vmem [resolvable:$true] %s55_s15 }
  0x15   :  { %s789_s19 = scalar_lea.hbm %s1129_s0, 128 }
  0x16   :  { %p790_p8 = scmp.ne.s32.totalorder %s1129_s0, %s789_s19  ;;  %p793_p9 = scmp.lt.u32.totalorder %s789_s19, %s1129_s0 }
  0x18   :  { %p795_p10 = pnand %p793_p9, %p790_p8 }
  0x1a   :  { %798 = shalt.err (!%p795_p10)
}
  0x1b   :  { %s799_s5 = scalar_lea.vmem %s26_s13, 128  ;;  %p804_p12 = scmp.lt.s32.totalorder %s26_s13, %s26_s13 }
  0x1c   :  { %p800_p11 = scmp.ne.s32.totalorder %s26_s13, %s799_s5  ;;  %p805_p13 = scmp.lt.s32.totalorder %s799_s5, %s799_s5 }
  0x1e   :  { %p806_p0 = por %p805_p13, %p804_p12 }
  0x20   :  { %p807_p1 = pnand %p806_p0, %p800_p11 }
  0x22   :  { %810 = shalt.err (!%p807_p1)
}
  0x23   :  { %28 = dma.hbm_to_vmem [thread:$0]  %s1129_s0, 128, %s26_s13, [#allocation3]  }
  0x24   :  { %s811_s27 = scalar_lea.hbm %s1135_s6, 16 }
  0x25   :  { %p812_p2 = scmp.ne.s32.totalorder %s1135_s6, %s811_s27  ;;  %p815_p3 = scmp.lt.u32.totalorder %s811_s27, %s1135_s6 }
  0x27   :  { %p817_p4 = pnand %p815_p3, %p812_p2 }
  0x29   :  { %820 = shalt.err (!%p817_p4)
}
  0x2a   :  { %s821_s14 = scalar_lea.vmem %s56_s15, 16  ;;  %s825_s16 = scalar_lea.vmem %s56_s15, 32 }
  0x2b   :  { %p822_p5 = scmp.ne.s32.totalorder %s56_s15, %s821_s14  ;;  %p826_p6 = scmp.lt.s32.totalorder %s56_s15, %s56_s15 }
  0x2c   :  { %p827_p7 = scmp.lt.s32.totalorder %s825_s16, %s821_s14 }
  0x2e   :  { %p828_p8 = por %p827_p7, %p826_p6 }
  0x30   :  { %p829_p9 = pnand %p828_p8, %p822_p5 }
  0x32   :  { %832 = shalt.err (!%p829_p9)
}
  0x33   :  { %58 = dma.hbm_to_vmem [thread:$0]  %s1135_s6, 16, %s56_s15, [#allocation6]  }
  0x34   :  { %855 = dma.done.wait [#allocation3], 128  }
  0x35   :  { %856 = vsyncadd [#allocation3], 4294967168 }
  0x36   :  { %857 = dma.done.wait [#allocation6], 2064  }
  0x37   :  { %858 = vsyncadd [#allocation6], 4294965232  ;;  %v866_v0 = vmov 0.0|0.0   ;;  %vm867_vm0 = vmmov 0   ;;  %v868_v1 = vmov 0.0   ;;  %v77_v2 = vld [vmem:[%s1130_s1] sm:$0xff] }
  0x38   :  { %679 = vmatprep.subr.bf16.mxu0 %v866_v0  ;;  %571 = vmatprep.mubr.msk.f32.mxu0 %vm867_vm0, %v868_v1  ;;  %486 = vst [vmem:[#allocation8] sm:$0xff] %v868_v1  ;;  %v78_v3 = vld [vmem:[%s1130_s1 + $0x8] sm:$0xff]  ;;  %v161_v5 = vld [vmem:[%s1132_s3] sm:$0xff]  ;;  %v163_v7 = vld [vmem:[%s1132_s3 + $0x10] sm:$0xff]  ;;  %vm86_vm1 = vcmask 130048   ;;  %vm464_vm2 = vcmask 57344  }
  0x39   :  { %682 = vmatprep.subr.bf16.mxu1 %v866_v0  ;;  %606 = vmatprep.mubr.msk.f32.mxu1 %vm867_vm0, %v868_v1  ;;  %v680_v4 = vpack.c.bf16 %v78_v3, %v77_v2  ;;  %v162_v6 = vld [vmem:[%s1132_s3 + $0x8] sm:$0xff]  ;;  %v164_v9 = vld [vmem:[%s1132_s3 + $0x18] sm:$0xff]  ;;  %v76_v10 = vld [vmem:[#allocation2] sm:$0xff]  ;;  %vm477_vm3 = vcmask 64512   ;;  %vm488_vm4 = vcmask 72768  }
  0x3a   :  { %v683_v8 = vpack.c.bf16 %v162_v6, %v161_v5  ;;  %v686_v11 = vpack.c.bf16 %v164_v9, %v163_v7  ;;  %v165_v12 = vld [vmem:[%s1132_s3 + $0x20] sm:$0xff]  ;;  %v166_v13 = vld [vmem:[%s1132_s3 + $0x28] sm:$0xff]  ;;  %v167_v15 = vld [vmem:[%s1132_s3 + $0x30] sm:$0xff] }
  0x3b   :  { %681 = vmatpush3.bf16.msra.mxu0 %v680_v4  ;;  %v689_v14 = vpack.c.bf16 %v166_v13, %v165_v12  ;;  %v168_v16 = vld [vmem:[%s1132_s3 + $0x38] sm:$0xff]  ;;  %v169_v18 = vld [vmem:[%s1132_s3 + $0x40] sm:$0xff]  ;;  %v170_v19 = vld [vmem:[%s1132_s3 + $0x48] sm:$0xff] }
  0x3c   :  { %684 = vmatpush3.bf16.msra.mxu1 %v683_v8  ;;  %706 = vmatprep.subr.bf16.mxu0 %v866_v0  ;;  %v692_v17 = vpack.c.bf16 %v168_v16, %v167_v15  ;;  %v695_v20 = vpack.c.bf16 %v170_v19, %v169_v18  ;;  %v171_v21 = vld [vmem:[%s1132_s3 + $0x50] sm:$0xff]  ;;  %v172_v22 = vld [vmem:[%s1132_s3 + $0x58] sm:$0xff]  ;;  %v173_v24 = vld [vmem:[%s1132_s3 + $0x60] sm:$0xff] }
  0x3d   :  { %685 = vmatprep.subr.bf16.mxu1 %v866_v0  ;;  %v698_v23 = vpack.c.bf16 %v172_v22, %v171_v21  ;;  %v174_v25 = vld [vmem:[%s1132_s3 + $0x68] sm:$0xff]  ;;  %v175_v27 = vld [vmem:[%s1132_s3 + $0x70] sm:$0xff]  ;;  %v176_v28 = vld [vmem:[%s1132_s3 + $0x78] sm:$0xff] }
  0x3e   :  { %572 = vmatmul.mubr.msk.f32.vlgmr.msra.gmra.mrb[0].mxu0 %vm86_vm1, %v76_v10  ;;  %v701_v26 = vpack.c.bf16 %v174_v25, %v173_v24  ;;  %v704_v29 = vpack.c.bf16 %v176_v28, %v175_v27  ;;  %v255_v30 = vld [vmem:[#allocation5] sm:$0xff]  ;;  %v256_v31 = vld [vmem:[#allocation5 + $0x8] sm:$0xff]  ;;  %v257_v32 = vld [vmem:[#allocation5 + $0x10] sm:$0xff] }
  0x3f   :  { %641 = vmatprep.mubr.msk.f32.mxu0 %vm867_vm0, %v868_v1  ;;  %v707_v33 = vpack.c.bf16 %v256_v31, %v255_v30  ;;  %v258_v34 = vld [vmem:[#allocation5 + $0x18] sm:$0xff]  ;;  %v259_v36 = vld [vmem:[#allocation5 + $0x20] sm:$0xff]  ;;  %v260_v37 = vld [vmem:[#allocation5 + $0x28] sm:$0xff] }
  0x40   :  { %687 = vmatpush3.bf16.msra.mxu1 %v686_v11  ;;  %v710_v35 = vpack.c.bf16 %v258_v34, %v257_v32  ;;  %v713_v38 = vpack.c.bf16 %v260_v37, %v259_v36  ;;  %v261_v39 = vld [vmem:[#allocation5 + $0x30] sm:$0xff]  ;;  %v262_v40 = vld [vmem:[#allocation5 + $0x38] sm:$0xff]  ;;  %v263_v42 = vld [vmem:[#allocation5 + $0x40] sm:$0xff]  ;;  %v453_v37 = vlaneseq }
  0x41   :  { %688 = vmatprep.subr.bf16.mxu1 %v866_v0  ;;  %708 = vmatpush3.bf16.msra.mxu0 %v707_v33  ;;  %v716_v41 = vpack.c.bf16 %v262_v40, %v261_v39  ;;  %v264_v43 = vld [vmem:[#allocation5 + $0x48] sm:$0xff]  ;;  %v265_v45 = vld [vmem:[#allocation5 + $0x50] sm:$0xff]  ;;  %v266_v46 = vld [vmem:[#allocation5 + $0x58] sm:$0xff] }
  0x42   :  { %709 = vmatprep.subr.bf16.mxu0 %v866_v0  ;;  %v719_v44 = vpack.c.bf16 %v264_v43, %v263_v42  ;;  %v722_v47 = vpack.c.bf16 %v266_v46, %v265_v45  ;;  %v267_v48 = vld [vmem:[#allocation5 + $0x60] sm:$0xff]  ;;  %v268_v49 = vld [vmem:[#allocation5 + $0x68] sm:$0xff]  ;;  %v506_v51 = vld [vmem:[%s1131_s2] ss:$0 sm:$0xff]  ;;  %v454_v39 = vshrl.u32 %v453_v37, 7 }
  0x43   :  { %v725_v50 = vpack.c.bf16 %v268_v49, %v267_v48  ;;  %v269_v56 = vld [vmem:[#allocation5 + $0x70] sm:$0xff]  ;;  %v270_v57 = vld [vmem:[#allocation5 + $0x78] sm:$0xff]  ;;  %v350_v60 = vld [vmem:[%s1136_s7 + $0x8] sm:$0xff] }
  0x44   :  { %690 = vmatpush3.bf16.msra.mxu1 %v689_v14  ;;  %v728_v58 = vpack.c.bf16 %v270_v57, %v269_v56  ;;  %v349_v59 = vld [vmem:[%s1136_s7] sm:$0xff]  ;;  %v351_v61 = vld [vmem:[%s1136_s7 + $0x10] sm:$0xff]  ;;  %v352_v63 = vld [vmem:[%s1136_s7 + $0x18] sm:$0xff]  ;;  %v455_v40 = vsub.s32 0, %v454_v39 }
  0x45   :  { %691 = vmatprep.subr.bf16.mxu1 %v866_v0  ;;  %711 = vmatpush3.bf16.msra.mxu0 %v710_v35  ;;  %v731_v62 = vpack.c.bf16 %v350_v60, %v349_v59  ;;  %v353_v2 = vld [vmem:[%s1136_s7 + $0x20] sm:$0xff]  ;;  %v354_v3 = vld [vmem:[%s1136_s7 + $0x28] sm:$0xff]  ;;  %v355_v5 = vld [vmem:[%s1136_s7 + $0x30] sm:$0xff] }
  0x46   :  { %712 = vmatprep.subr.bf16.mxu0 %v866_v0  ;;  %v737_v4 = vpack.c.bf16 %v354_v3, %v353_v2  ;;  %v356_v6 = vld [vmem:[%s1136_s7 + $0x38] sm:$0xff]  ;;  %v357_v8 = vld [vmem:[%s1136_s7 + $0x40] sm:$0xff]  ;;  %v358_v9 = vld [vmem:[%s1136_s7 + $0x48] sm:$0xff] }
  0x47   :  { %v740_v7 = vpack.c.bf16 %v356_v6, %v355_v5  ;;  %v743_v10 = vpack.c.bf16 %v358_v9, %v357_v8  ;;  %v359_v11 = vld [vmem:[%s1136_s7 + $0x50] sm:$0xff]  ;;  %v360_v12 = vld [vmem:[%s1136_s7 + $0x58] sm:$0xff]  ;;  %v361_v14 = vld [vmem:[%s1136_s7 + $0x60] sm:$0xff] }
  0x48   :  { %693 = vmatpush3.bf16.msra.mxu1 %v692_v17  ;;  %v746_v13 = vpack.c.bf16 %v360_v12, %v359_v11  ;;  %v362_v15 = vld [vmem:[%s1136_s7 + $0x68] sm:$0xff]  ;;  %v508_v17 = vld [vmem:[%s1133_s4] ss:$0 sm:$0xff]  ;;  %v363_v22 = vld [vmem:[%s1136_s7 + $0x70] sm:$0xff] }
  0x49   :  { %694 = vmatprep.subr.bf16.mxu1 %v866_v0  ;;  %714 = vmatpush3.bf16.msra.mxu0 %v713_v38  ;;  %v749_v16 = vpack.c.bf16 %v362_v15, %v361_v14  ;;  %v451_v43 = vld [vmem:[%s1139_s10] sm:$0xff]  ;;  %s869_s10 = smov [#allocation8]  }
  0x4a   :  { %715 = vmatprep.subr.bf16.mxu0 %v866_v0  ;;  %s496_s17 = sshll.u32 %s869_s10, 4  ;;  %s497_s17 = int_to_ptr.vmem [resolvable:$true] %s496_s17 }
  0x4b   :  { %p838_p11 = scmp.lt.s32.totalorder %s497_s17, %s497_s17 }
  0x4c   :  { %696 = vmatpush3.bf16.msra.mxu1 %v695_v20 }
  0x4d   :  { %697 = vmatprep.subr.bf16.mxu1 %v866_v0  ;;  %717 = vmatpush3.bf16.msra.mxu0 %v716_v41 }
  0x4e   :  { %718 = vmatprep.subr.bf16.mxu0 %v866_v0 }
  0x50   :  { %699 = vmatpush3.bf16.msra.mxu1 %v698_v23  ;;  %v364_v23 = vld [vmem:[%s1136_s7 + $0x78] sm:$0xff] }
  0x51   :  { %700 = vmatprep.subr.bf16.mxu1 %v866_v0  ;;  %720 = vmatpush3.bf16.msra.mxu0 %v719_v44  ;;  %v752_v24 = vpack.c.bf16 %v364_v23, %v363_v22  ;;  %v510_v44 = vld [vmem:[%s1137_s8] ss:$0 sm:$0xff]  ;;  %s833_s8 = scalar_lea.vmem %s497_s17, 128 }
  0x52   :  { %721 = vmatprep.subr.bf16.mxu0 %v866_v0  ;;  %p834_p10 = scmp.ne.s32.totalorder %s497_s17, %s833_s8  ;;  %p839_p12 = scmp.lt.s32.totalorder %s833_s8, %s833_s8 }
  0x54   :  { %702 = vmatpush3.bf16.msra.mxu1 %v701_v26  ;;  %p840_p13 = por %p839_p12, %p838_p11 }
  0x55   :  { %703 = vmatprep.subr.bf16.mxu1 %v866_v0  ;;  %723 = vmatpush3.bf16.msra.mxu0 %v722_v47 }
  0x56   :  { %724 = vmatprep.subr.bf16.mxu0 %v866_v0  ;;  %p841_p0 = pnand %p840_p13, %p834_p10 }
  0x58   :  { %705 = vmatpush3.bf16.msra.mxu1 %v704_v29  ;;  %v442_v29 = vld [vmem:[%s1138_s9] sm:$0x1] }
  0x59   :  { %730 = vmatprep.subr.bf16.mxu1 %v866_v0  ;;  %726 = vmatpush3.bf16.msra.mxu0 %v725_v50  ;;  %v443_v30 = vmax.f32 %v442_v29, -20.0 }
  0x5a   :  { %727 = vmatprep.subr.bf16.mxu0 %v866_v0 }
  0x5b   :  { %v444_v31 = vmin.f32 %v443_v30, 2.0 }
  0x5d   :  { %729 = vmatpush3.bf16.msra.mxu0 %v728_v58  ;;  %v462_v32 = vsub.f32 0.0, %v444_v31  ;;  %v445_v35 = vmul.f32 1.442695, %v444_v31  ;;  %v447_v36 = vmul.f32 -2.0, %v444_v31 }
  0x5f   :  { %v512_v33 = vadd.f32 -0.9189385, %v462_v32  ;;  %763 = vpow2.f32 %v445_v35  ;;  %v448_v38 = vmul.f32 1.442695, %v447_v36 }
  0x61   :  { %v465_v34 = vsel %vm464_vm2, %v512_v33, 0.0  ;;  %765 = vpow2.f32 %v448_v38 }
  0x62   :  { %466 = vadd.xlane.f32.xlu0 %v465_v34 }
  0x69   :  { %v764_v41 = vpop.eup %763 }
  0x6a   :  { %v456_v42 = vrot.slane %v764_v41, %v455_v40 }
  0x6b   :  { %v766_v46 = vpop.eup %765 }
  0x6c   :  { %v458_v45 = vmul.f32 %v456_v42, %v451_v43 }
  0xef   :  { %v467_v58 = vpop.xlane.xlu0 %466 }
  0xf0   :  { %v484_v59 = vrot.slane %v467_v58, %v455_v40 }
 0x111   :  { %v156_v52 = vpop.f32.mrb[0].mxu0 }
 0x112   :  { %v157_v53 = vadd.f32 %v506_v51, %v156_v52  ;;  %v573_v54 = vpop.f32.mrb[1].mxu0  ;;  %v450_v51 = vmul.f32 0.5, %v766_v46 }
 0x114   :  { %v160_v55 = vmax.f32 %v157_v53, 0.0  ;;  %v474_v54 = vrot.slane %v450_v51, %v455_v40 }
 0x116   :  { %607 = vmatmul.mubr.f32.vlgmr.msra.gmra.mrb[0].mxu1 %v160_v55 }
 0x117   :  { %676 = vmatprep.mubr.msk.f32.mxu1 %vm867_vm0, %v868_v1  ;;  %732 = vmatpush3.bf16.msra.mxu1 %v731_v62  ;;  %v734_v1 = vpack.c.bf16 %v352_v63, %v351_v61 }
 0x118   :  { %733 = vmatprep.subr.bf16.mxu1 %v866_v0 }
 0x11b   :  { %735 = vmatpush3.bf16.msra.mxu1 %v734_v1 }
 0x11c   :  { %736 = vmatprep.subr.bf16.mxu1 %v866_v0 }
 0x11f   :  { %738 = vmatpush3.bf16.msra.mxu1 %v737_v4 }
 0x120   :  { %739 = vmatprep.subr.bf16.mxu1 %v866_v0 }
 0x123   :  { %741 = vmatpush3.bf16.msra.mxu1 %v740_v7 }
 0x124   :  { %742 = vmatprep.subr.bf16.mxu1 %v866_v0 }
 0x127   :  { %744 = vmatpush3.bf16.msra.mxu1 %v743_v10 }
 0x128   :  { %745 = vmatprep.subr.bf16.mxu1 %v866_v0 }
 0x12b   :  { %747 = vmatpush3.bf16.msra.mxu1 %v746_v13 }
 0x12c   :  { %748 = vmatprep.subr.bf16.mxu1 %v866_v0 }
 0x12f   :  { %750 = vmatpush3.bf16.msra.mxu1 %v749_v16 }
 0x130   :  { %751 = vmatprep.subr.bf16.mxu1 %v866_v0  ;;  %v509_v0 = vld [vmem:[#allocation7] ss:$0 sm:$0xff] }
 0x133   :  { %753 = vmatpush3.bf16.msra.mxu1 %v752_v24 }
 0x1e9   :  { %v250_v18 = vpop.f32.mrb[0].mxu1 }
 0x1ea   :  { %v251_v19 = vadd.f32 %v508_v17, %v250_v18  ;;  %v608_v20 = vpop.f32.mrb[1].mxu1 }
 0x1ec   :  { %v254_v21 = vmax.f32 %v251_v19, 0.0 }
 0x1ee   :  { %642 = vmatmul.mubr.f32.vlgmr.msra.gmra.mrb[2].mxu0 %v254_v21 }
 0x2c1   :  { %v344_v25 = vpop.f32.mrb[2].mxu0 }
 0x2c2   :  { %v345_v26 = vadd.f32 %v509_v0, %v344_v25  ;;  %v643_v27 = vpop.f32.mrb[3].mxu0 }
 0x2c4   :  { %v348_v28 = vmax.f32 %v345_v26, 0.0 }
 0x2c6   :  { %677 = vmatmul.mubr.f32.vlgmr.msra.gmra.mrb[2].mxu1 %v348_v28 }
 0x399   :  { %v438_v47 = vpop.f32.mrb[2].mxu1 }
 0x39a   :  { %v439_v48 = vadd.f32 %v510_v44, %v438_v47  ;;  %v678_v49 = vpop.f32.mrb[3].mxu1 }
 0x39c   :  { %v459_v50 = vadd.f32 %v458_v45, %v439_v48 }
 0x39e   :  { %v511_v52 = vclamps-f32 %v459_v50, 1.0 }
 0x3a0   :  { %v468_v53 = vsub.f32 %v511_v52, %v439_v48  ;;  %487 = vst.msk [vmem:[#allocation8] sm:$0xff] %vm477_vm3, %v511_v52 }
 0x3a2   :  { %v469_v55 = vmul.f32 %v468_v53, %v468_v53 }
 0x3a4   :  { %v476_v56 = vmul.f32 %v474_v54, %v469_v55 }
 0x3a6   :  { %v478_v57 = vsel %vm477_vm3, %v476_v56, 0.0 }
 0x3a7   :  { %479 = vadd.xlane.f32.xlu0 %v478_v57 }
 0x434   :  { %v480_v60 = vpop.xlane.xlu0 %479 }
 0x435   :  { %v485_v61 = vsub.f32 %v484_v59, %v480_v60 }
 0x437   :  { %489 = vst.msk [vmem:[#allocation8] sm:$0xff] %vm488_vm4, %v485_v61 }
 0x438   :  { %844 = shalt.err (!%p841_p0)
}
 0x439   :  { %s845_s21 = scalar_lea.hbm %s1140_s11, 128 }
 0x43a   :  { %p846_p1 = scmp.ne.s32.totalorder %s1140_s11, %s845_s21  ;;  %p849_p2 = scmp.lt.u32.totalorder %s845_s21, %s1140_s11 }
 0x43c   :  { %p851_p3 = pnand %p849_p2, %p846_p1 }
 0x43e   :  { %854 = shalt.err (!%p851_p3)
}
 0x43f   :  { %499 = dma.vmem_to_hbm [thread:$0]  %s497_s17, 128, %s1140_s11, [#allocation4]  }
 0x440   :  { %859 = dma.done.wait [#allocation4], 128  }
 0x441   :  { %860 = vsyncadd [#allocation4], 4294967168 }
 0x442   :  { %503 = vsyncpa [#allocation3], 1 }
 0x443   :  { %504 = vsyncpa [#allocation6], 1 }
 0x444   :  { %505 = vsyncpa [#allocation4], 1 }

</bundles_post_ra>
